<compile_context>
chip_gen: v6e
topology: v6e:2x2x1
jax: 0.10.0
libtpu: 0.0.40
codegen_flags: <defaults>
</compile_context>

<pallas_src>
import jax
import jax.numpy as jnp
from jax.experimental import pallas as pl
from jax.experimental.pallas import tpu as pltpu


def _channel_linear_kernel(x_ref, w_ref, b_ref, o_ref):
    # x_ref: (TB, C*Din)        -- native contiguous layout (free reshape of x)
    # w_ref: (C, Din, Dout)     -- native per-channel weights (no expansion)
    # b_ref: (C, 1, Dout)       -- per-channel bias
    # o_ref: (TB, N_pad)        -- lane-dense output slab, N = C*Dout <= N_pad
    num_channels, input_dim, output_dim = w_ref.shape
    tile_b, n_pad = o_ref.shape

    pieces = []
    for c in range(num_channels):  # static unroll; C is small
        x_c = x_ref[:, c * input_dim:(c + 1) * input_dim]          # (TB, Din)
        y_c = jnp.dot(x_c, w_ref[c], preferred_element_type=jnp.float32)
        y_c = y_c + b_ref[c].astype(jnp.float32)                   # (1, Dout) bcast
        pieces.append(y_c)

    n = num_channels * output_dim
    if n_pad > n:
        pieces.append(jnp.zeros((tile_b, n_pad - n), dtype=jnp.float32))

    # One full-width (unmasked, lane-dense) store of the assembled row slab.
    o_ref[...] = jnp.concatenate(pieces, axis=-1).astype(o_ref.dtype)


def _pick_batch_tile(batch, max_tile=512):
    """Largest 8-aligned divisor of batch <= max_tile (full batch if small/odd)."""
    if batch <= max_tile:
        return batch
    for t in range(max_tile, 7, -8):
        if batch % t == 0:
            return t
    # TODO(synk): ragged batch handling (pad batch or mask the tail tile).
    return batch


def linear_with_channels(x, w, b):
    """x: (batch, C, Din), w: (C, Din, Dout), b: (C, 1, Dout) -> (batch, C, Dout)."""
    batch, num_channels, input_dim = x.shape
    _, _, output_dim = w.shape
    K = num_channels * input_dim        # folded x row width
    N = num_channels * output_dim       # useful output row width
    n_pad = ((N + 127) // 128) * 128    # lane-dense (128-multiple) output width

    # Free, contiguous reshape -- x never gets transposed/rewritten in HBM.
    x2d = x.reshape(batch, K)

    tile_b = _pick_batch_tile(batch)
    grid = (batch // tile_b,)

    itemsize = jnp.dtype(x.dtype).itemsize
    # Useful work only (no block-diagonal zero FLOPs / bytes).
    flops = 2 * batch * num_channels * input_dim * output_dim
    bytes_accessed = (batch * K                                 # x
                      + num_channels * input_dim * output_dim   # w (read once)
                      + num_channels * output_dim               # b
                      + batch * N) * itemsize                   # out

    # Explicit VMEM budget: double-buffered x/out tiles + resident w/b + slack.
    vmem_bytes = (2 * itemsize * (tile_b * K + tile_b * n_pad)
                  + itemsize * (num_channels * input_dim * output_dim
                                + num_channels * output_dim)
                  + (1 << 20))
    vmem_limit = int(min(max(vmem_bytes, 4 << 20), 64 << 20))  # v7x-safe cap

    out2d = pl.pallas_call(
        _channel_linear_kernel,
        out_shape=jax.ShapeDtypeStruct((batch, n_pad), x.dtype),
        grid=grid,
        in_specs=[
            pl.BlockSpec((tile_b, K), lambda i: (i, 0)),
            # Weight/bias block indices are grid-invariant -> fetched once.
            pl.BlockSpec((num_channels, input_dim, output_dim),
                         lambda i: (0, 0, 0)),
            pl.BlockSpec((num_channels, 1, output_dim), lambda i: (0, 0, 0)),
        ],
        out_specs=pl.BlockSpec((tile_b, n_pad), lambda i: (i, 0)),
        compiler_params=pltpu.CompilerParams(
            dimension_semantics=("parallel",),   # shards batch tiles across TCs
            vmem_limit_bytes=vmem_limit,
        ),
        cost_estimate=pl.CostEstimate(
            flops=flops, transcendentals=0, bytes_accessed=bytes_accessed),
    )(x2d, w, b)

    if n_pad != N:
        out2d = out2d[:, :N]
    # Free, contiguous reshape back to the module's (B, C, Dout) layout.
    return out2d.reshape(batch, num_channels, output_dim)


if __name__ == "__main__":
    # small shapes consistent with the module's forward
    batch, num_channels, input_dim, output_dim = 8, 4, 32, 16

    key = jax.random.PRNGKey(0)
    kx, kw, kb = jax.random.split(key, 3)

    x = jax.random.normal(kx, (batch, num_channels, input_dim), dtype=jnp.float32)
    w = 0.1 * jax.random.normal(
        kw, (num_channels, input_dim, output_dim), dtype=jnp.float32
    )
    b = 0.1 * jax.random.normal(
        kb, (num_channels, 1, output_dim), dtype=jnp.float32
    )

    fn = jax.jit(linear_with_channels)
    out = jax.block_until_ready(fn(x, w, b))

    # reference: per-channel linear in plain JAX
    ref = jnp.einsum("bci,cio->bco", x, w) + jnp.transpose(b, (1, 0, 2))
    assert out.shape == (batch, num_channels, output_dim)
    assert jnp.allclose(out, ref, atol=1e-5, rtol=1e-5), "mismatch vs reference"

    print("KERNEL_OK")
</pallas_src>

<mosaic_0001>
module attributes {stable_mosaic.version = 11 : i64} {
  func.func @_channel_linear_kernel(%arg0: i32, %arg1: memref<8x128xf32, #tpu.memory_space<vmem>>, %arg2: memref<4x32x16xf32, #tpu.memory_space<vmem>>, %arg3: memref<4x1x16xf32, #tpu.memory_space<vmem>>, %arg4: memref<8x128xf32, #tpu.memory_space<vmem>>) attributes {dimension_semantics = [#tpu.dimension_semantics<parallel>], iteration_bounds = array<i64: 1>, scalar_prefetch = 0 : i64, scratch_operands = 0 : i64, tpu.core_type = #tpu.core_type<tc>, window_params = [{transform_indices = @transform_0, window_bounds = array<i64: 8, 128>}, {pipeline_mode = #tpu.pipeline_mode<synchronous>, transform_indices = @transform_1, window_bounds = array<i64: 4, 32, 16>}, {pipeline_mode = #tpu.pipeline_mode<synchronous>, transform_indices = @transform_2, window_bounds = array<i64: 4, 1, 16>}, {transform_indices = @transform_3, window_bounds = array<i64: 8, 128>}]} {
    %c0 = arith.constant 0 : index
    %c0_0 = arith.constant 0 : index
    %0 = vector.load %arg1[%c0, %c0_0] : memref<8x128xf32, #tpu.memory_space<vmem>>, vector<8x32xf32>
    %c0_1 = arith.constant 0 : index
    %c0_2 = arith.constant 0 : index
    %c0_3 = arith.constant 0 : index
    %1 = vector.load %arg2[%c0_1, %c0_2, %c0_3] : memref<4x32x16xf32, #tpu.memory_space<vmem>>, vector<1x32x16xf32>
    %2 = vector.shape_cast %1 : vector<1x32x16xf32> to vector<32x16xf32>
    %cst = arith.constant dense<0.000000e+00> : vector<8x16xf32>
    %3 = tpu.matmul %0, %2, %cst {dimension_numbers = #tpu.dot_dimension_numbers<[1], [0], [0], [1], [0, 0, 1, 1], [], []>} : vector<8x32xf32>, vector<32x16xf32>, vector<8x16xf32> -> vector<8x16xf32>
    %c0_4 = arith.constant 0 : index
    %c0_5 = arith.constant 0 : index
    %c0_6 = arith.constant 0 : index
    %4 = vector.load %arg3[%c0_4, %c0_5, %c0_6] : memref<4x1x16xf32, #tpu.memory_space<vmem>>, vector<1x1x16xf32>
    %5 = vector.shape_cast %4 : vector<1x1x16xf32> to vector<1x16xf32>
    %6 = vector.broadcast %5 : vector<1x16xf32> to vector<8x16xf32>
    %7 = arith.addf %3, %6 : vector<8x16xf32>
    %c0_7 = arith.constant 0 : index
    %c32 = arith.constant 32 : index
    %8 = vector.load %arg1[%c0_7, %c32] : memref<8x128xf32, #tpu.memory_space<vmem>>, vector<8x32xf32>
    %c1 = arith.constant 1 : index
    %c0_8 = arith.constant 0 : index
    %c0_9 = arith.constant 0 : index
    %9 = vector.load %arg2[%c1, %c0_8, %c0_9] : memref<4x32x16xf32, #tpu.memory_space<vmem>>, vector<1x32x16xf32>
    %10 = vector.shape_cast %9 : vector<1x32x16xf32> to vector<32x16xf32>
    %cst_10 = arith.constant dense<0.000000e+00> : vector<8x16xf32>
    %11 = tpu.matmul %8, %10, %cst_10 {dimension_numbers = #tpu.dot_dimension_numbers<[1], [0], [0], [1], [0, 0, 1, 1], [], []>} : vector<8x32xf32>, vector<32x16xf32>, vector<8x16xf32> -> vector<8x16xf32>
    %c1_11 = arith.constant 1 : index
    %c0_12 = arith.constant 0 : index
    %c0_13 = arith.constant 0 : index
    %12 = vector.load %arg3[%c1_11, %c0_12, %c0_13] : memref<4x1x16xf32, #tpu.memory_space<vmem>>, vector<1x1x16xf32>
    %13 = vector.shape_cast %12 : vector<1x1x16xf32> to vector<1x16xf32>
    %14 = vector.broadcast %13 : vector<1x16xf32> to vector<8x16xf32>
    %15 = arith.addf %11, %14 : vector<8x16xf32>
    %c0_14 = arith.constant 0 : index
    %c64 = arith.constant 64 : index
    %16 = vector.load %arg1[%c0_14, %c64] : memref<8x128xf32, #tpu.memory_space<vmem>>, vector<8x32xf32>
    %c2 = arith.constant 2 : index
    %c0_15 = arith.constant 0 : index
    %c0_16 = arith.constant 0 : index
    %17 = vector.load %arg2[%c2, %c0_15, %c0_16] : memref<4x32x16xf32, #tpu.memory_space<vmem>>, vector<1x32x16xf32>
    %18 = vector.shape_cast %17 : vector<1x32x16xf32> to vector<32x16xf32>
    %cst_17 = arith.constant dense<0.000000e+00> : vector<8x16xf32>
    %19 = tpu.matmul %16, %18, %cst_17 {dimension_numbers = #tpu.dot_dimension_numbers<[1], [0], [0], [1], [0, 0, 1, 1], [], []>} : vector<8x32xf32>, vector<32x16xf32>, vector<8x16xf32> -> vector<8x16xf32>
    %c2_18 = arith.constant 2 : index
    %c0_19 = arith.constant 0 : index
    %c0_20 = arith.constant 0 : index
    %20 = vector.load %arg3[%c2_18, %c0_19, %c0_20] : memref<4x1x16xf32, #tpu.memory_space<vmem>>, vector<1x1x16xf32>
    %21 = vector.shape_cast %20 : vector<1x1x16xf32> to vector<1x16xf32>
    %22 = vector.broadcast %21 : vector<1x16xf32> to vector<8x16xf32>
    %23 = arith.addf %19, %22 : vector<8x16xf32>
    %c0_21 = arith.constant 0 : index
    %c96 = arith.constant 96 : index
    %24 = vector.load %arg1[%c0_21, %c96] : memref<8x128xf32, #tpu.memory_space<vmem>>, vector<8x32xf32>
    %c3 = arith.constant 3 : index
    %c0_22 = arith.constant 0 : index
    %c0_23 = arith.constant 0 : index
    %25 = vector.load %arg2[%c3, %c0_22, %c0_23] : memref<4x32x16xf32, #tpu.memory_space<vmem>>, vector<1x32x16xf32>
    %26 = vector.shape_cast %25 : vector<1x32x16xf32> to vector<32x16xf32>
    %cst_24 = arith.constant dense<0.000000e+00> : vector<8x16xf32>
    %27 = tpu.matmul %24, %26, %cst_24 {dimension_numbers = #tpu.dot_dimension_numbers<[1], [0], [0], [1], [0, 0, 1, 1], [], []>} : vector<8x32xf32>, vector<32x16xf32>, vector<8x16xf32> -> vector<8x16xf32>
    %c3_25 = arith.constant 3 : index
    %c0_26 = arith.constant 0 : index
    %c0_27 = arith.constant 0 : index
    %28 = vector.load %arg3[%c3_25, %c0_26, %c0_27] : memref<4x1x16xf32, #tpu.memory_space<vmem>>, vector<1x1x16xf32>
    %29 = vector.shape_cast %28 : vector<1x1x16xf32> to vector<1x16xf32>
    %30 = vector.broadcast %29 : vector<1x16xf32> to vector<8x16xf32>
    %31 = arith.addf %27, %30 : vector<8x16xf32>
    %cst_28 = arith.constant 0.000000e+00 : f32
    %32 = vector.broadcast %cst_28 : f32 to vector<8x64xf32>
    %33 = tpu.concatenate %7, %15, %23, %31, %32 in 1 : vector<8x16xf32>, vector<8x16xf32>, vector<8x16xf32>, vector<8x16xf32>, vector<8x64xf32> -> vector<8x128xf32>
    %c0_29 = arith.constant 0 : index
    %c0_30 = arith.constant 0 : index
    %34 = vector.load %arg4[%c0_29, %c0_30] : memref<8x128xf32, #tpu.memory_space<vmem>>, vector<8x128xf32>
    tpu.vector_store %arg4[%c0_29, %c0_30], %33 {strides = array<i32>} : memref<8x128xf32, #tpu.memory_space<vmem>>, vector<8x128xf32>,
    return
  }
  func.func @transform_0(%arg0: i32) -> (i32, i32) {
    %c0_i32 = arith.constant 0 : i32
    %c0_i32_0 = arith.constant 0 : i32
    return %arg0, %c0_i32 : i32, i32
  }
  func.func @transform_1(%arg0: i32) -> (i32, i32, i32) {
    %c0_i32 = arith.constant 0 : i32
    %c0_i32_0 = arith.constant 0 : i32
    %c0_i32_1 = arith.constant 0 : i32
    %c0_i32_2 = arith.constant 0 : i32
    return %c0_i32, %c0_i32_0, %c0_i32_1 : i32, i32, i32
  }
  func.func @transform_2(%arg0: i32) -> (i32, i32, i32) {
    %c0_i32 = arith.constant 0 : i32
    %c0_i32_0 = arith.constant 0 : i32
    %c0_i32_1 = arith.constant 0 : i32
    %c0_i32_2 = arith.constant 0 : i32
    return %c0_i32, %c0_i32_0, %c0_i32_1 : i32, i32, i32
  }
  func.func @transform_3(%arg0: i32) -> (i32, i32) {
    %c0_i32 = arith.constant 0 : i32
    %c0_i32_0 = arith.constant 0 : i32
    return %arg0, %c0_i32 : i32, i32
  }
}

</mosaic_0001>

<bundles_post_ra>
// kernel: linear_with_channels.1
= control target key start
LH: loop header
LB: loop body
LE: loop exit
PB: predicated region body
PF: predicated region fallthrough
CT: control target
= control target key end

     0   :  { %v479_v1 = vmov 0.0   ;;  %s480_s16 = smov 96   ;;  %s481_s17 = smov 32   ;;  %vm26_vm0 = vcmask 261120   ;;  %vm483_vm1 = vmmov 0   ;;  %vm373_vm2 = vcmask 130048   ;;  %s603_s0 = inlined_call_operand.vmem [shape: f32[8,128], index: 0, kind: input, shape index: {}]   ;;  %s604_s1 = inlined_call_operand.vmem [shape: f32[4,32,16], index: 1, kind: input, shape index: {}]   ;;  %s605_s2 = inlined_call_operand.vmem [shape: f32[4,1,16], index: 2, kind: input, shape index: {}]   ;;  %s606_s3 = inlined_call_operand.vmem [shape: f32[8,128], index: 3, kind: output, shape index: {}]  }
   0x1   :  { %v14_v0 = vld [vmem:[%s603_s0] sm:$0xff]  ;;  %428 = vmatprep.subr.mxu0 %v479_v1  ;;  %v18_v2 = vld [vmem:[%s604_s1 + $0x18] sm:$0xff]  ;;  %439 = vmatprep.subr.mxu1 %v479_v1  ;;  %v17_v3 = vld [vmem:[%s604_s1 + $0x10] sm:$0xff]  ;;  %s482_s25 = smov 64   ;;  %s485_s27 = smov 48   ;;  %vm376_vm3 = vcmask 392192  }
   0x2   :  { %113 = vrot.lane.b32.xlu0 %v14_v0, %s480_s16  ;;  %287 = vrot.lane.b32.xlu1 %v14_v0, %s481_s17  ;;  %v390_v4 = vld [vmem:[%s604_s1 + $0x38] sm:$0xff]  ;;  %v389_v5 = vld [vmem:[%s604_s1 + $0x30] sm:$0xff]  ;;  %vm378_vm4 = vcmask 523264  }
   0x3   :  { %429 = vmatpush3.msra.mxu0 %v18_v2  ;;  %440 = vmatpush3.msra.mxu1 %v390_v4  ;;  %v16_v6 = vld [vmem:[%s604_s1 + $0x8] sm:$0xff]  ;;  %v15_v7 = vld [vmem:[%s604_s1] sm:$0xff]  ;;  %v397_v9 = vld [vmem:[%s604_s1 + $0x58] sm:$0xff] }
   0x4   :  { %430 = vmatprep.subr.mxu0 %v479_v1  ;;  %441 = vmatprep.subr.mxu1 %v479_v1  ;;  %v388_v8 = vld [vmem:[%s604_s1 + $0x28] sm:$0xff]  ;;  %v387_v10 = vld [vmem:[%s604_s1 + $0x20] sm:$0xff]  ;;  %v396_v11 = vld [vmem:[%s604_s1 + $0x50] sm:$0xff] }
   0x5   :  { %431 = vmatpush3.msra.mxu0 %v17_v3  ;;  %442 = vmatpush3.msra.mxu1 %v389_v5  ;;  %v395_v12 = vld [vmem:[%s604_s1 + $0x48] sm:$0xff]  ;;  %v394_v13 = vld [vmem:[%s604_s1 + $0x40] sm:$0xff]  ;;  %v404_v14 = vld [vmem:[%s604_s1 + $0x78] sm:$0xff] }
   0x6   :  { %200 = vrot.lane.b32.xlu0 %v14_v0, %s482_s25  ;;  %432 = vmatprep.subr.mxu0 %v479_v1  ;;  %v403_v16 = vld [vmem:[%s604_s1 + $0x70] sm:$0xff]  ;;  %v402_v17 = vld [vmem:[%s604_s1 + $0x68] sm:$0xff]  ;;  %v401_v19 = vld [vmem:[%s604_s1 + $0x60] sm:$0xff]  ;;  %s484_s1 = smov 16  }
   0x7   :  { %433 = vmatpush3.msra.mxu0 %v16_v6  ;;  %443 = vmatprep.subr.mxu1 %v479_v1  ;;  %v392_v23 = vld [vmem:[%s605_s2 + $0x1] ss:$0 sm:$0xff]  ;;  %v399_v27 = vld [vmem:[%s605_s2 + $0x2] ss:$0 sm:$0xff]  ;;  %v406_v31 = vld [vmem:[%s605_s2 + $0x3] ss:$0 sm:$0xff] }
   0x8   :  { %434 = vmatprep.subr.mxu0 %v479_v1  ;;  %436 = vmatprep.mubr.msk.f32.mxu0 %vm483_vm1, %v479_v1  ;;  %v385_v35 = vld [vmem:[%s605_s2] ss:$0 sm:$0xff] }
   0x9   :  { %435 = vmatpush3.msra.mxu0 %v15_v7  ;;  %444 = vmatpush3.msra.mxu1 %v388_v8 }
   0xa   :  { %450 = vmatprep.subr.mxu0 %v479_v1  ;;  %437 = vmatmul.mubr.msk.f32.vlgmr.msra.gmra.mxu0 %vm26_vm0, %v14_v0 }
   0xb   :  { %445 = vmatprep.subr.mxu1 %v479_v1  ;;  %451 = vmatpush3.msra.mxu0 %v397_v9 }
   0xc   :  { %446 = vmatpush3.msra.mxu1 %v387_v10  ;;  %452 = vmatprep.subr.mxu0 %v479_v1 }
   0xd   :  { %447 = vmatprep.mubr.msk.f32.mxu1 %vm483_vm1, %v479_v1  ;;  %461 = vmatprep.subr.mxu1 %v479_v1 }
   0xe   :  { %453 = vmatpush3.msra.mxu0 %v396_v11  ;;  %458 = vmatprep.mubr.msk.f32.mxu0 %vm483_vm1, %v479_v1 }
   0xf   :  { %454 = vmatprep.subr.mxu0 %v479_v1 }
  0x10   :  { %455 = vmatpush3.msra.mxu0 %v395_v12 }
  0x11   :  { %456 = vmatprep.subr.mxu0 %v479_v1 }
  0x12   :  { %457 = vmatpush3.msra.mxu0 %v394_v13 }
  0x74   :  { %v114_v15 = vpop.permute.xlu0 %113  ;;  %v288_v20 = vpop.permute.xlu1 %287 }
  0x75   :  { %448 = vmatmul.mubr.msk.f32.vlgmr.msra.gmra.mxu1 %vm26_vm0, %v114_v15 }
  0x76   :  { %462 = vmatpush3.msra.mxu1 %v404_v14  ;;  %469 = vmatprep.mubr.msk.f32.mxu1 %vm483_vm1, %v479_v1 }
  0x77   :  { %463 = vmatprep.subr.mxu1 %v479_v1 }
  0x78   :  { %464 = vmatpush3.msra.mxu1 %v403_v16  ;;  %v201_v18 = vpop.permute.xlu0 %200 }
  0x79   :  { %465 = vmatprep.subr.mxu1 %v479_v1  ;;  %459 = vmatmul.mubr.msk.f32.vlgmr.msra.gmra.mxu0 %vm26_vm0, %v201_v18 }
  0x7a   :  { %466 = vmatpush3.msra.mxu1 %v402_v17 }
  0x7b   :  { %467 = vmatprep.subr.mxu1 %v479_v1 }
  0x7c   :  { %468 = vmatpush3.msra.mxu1 %v401_v19 }
  0x7d   :  { %470 = vmatmul.mubr.msk.f32.vlgmr.msra.gmra.mxu1 %vm26_vm0, %v288_v20 }
  0xca   :  { %v96_v21 = vpop.f32.mrf.mxu0 }
  0xcb   :  { %v97_v37 = vadd.f32 %v385_v35, %v96_v21 }
  0xcc   :  { %v438_v22 = vpop.f32.mrf.mxu0 }
 0x135   :  { %v183_v24 = vpop.f32.mrf.mxu1 }
 0x136   :  { %v184_v25 = vadd.f32 %v392_v23, %v183_v24 }
 0x137   :  { %v449_v26 = vpop.f32.mrf.mxu1 }
 0x138   :  { %362 = vrot.lane.b32.xlu1 %v184_v25, %s484_s1 }
 0x139   :  { %v270_v28 = vpop.f32.mrf.mxu0 }
 0x13a   :  { %v271_v29 = vadd.f32 %v399_v27, %v270_v28 }
 0x13b   :  { %v460_v30 = vpop.f32.mrf.mxu0 }
 0x13c   :  { %366 = vrot.lane.b32.xlu0 %v271_v29, %s481_s17 }
 0x13d   :  { %v357_v32 = vpop.f32.mrf.mxu1 }
 0x13e   :  { %v358_v33 = vadd.f32 %v406_v31, %v357_v32 }
 0x13f   :  { %v471_v34 = vpop.f32.mrf.mxu1 }
 0x140   :  { %370 = vrot.lane.b32.xlu1 %v358_v33, %s485_s27 }
 0x1aa   :  { %v363_v36 = vpop.permute.xlu1 %362 }
 0x1ab   :  { %v374_v39 = vsel %vm373_vm2, %v97_v37, %v363_v36 }
 0x1ae   :  { %v367_v38 = vpop.permute.xlu0 %366 }
 0x1af   :  { %v375_v40 = vsel %vm26_vm0, %v374_v39, %v367_v38 }
 0x1b2   :  { %v371_v41 = vpop.permute.xlu1 %370 }
 0x1b3   :  { %v377_v42 = vsel %vm376_vm3, %v375_v40, %v371_v41 }
 0x1b4   :  { %v379_v43 = vsel %vm378_vm4, %v377_v42, 0.0 }
 0x1b5   :  { %380 = vst [vmem:[%s606_s3] sm:$0xff] %v379_v43 }

</bundles_post_ra>
